<compile_context>
chip_gen: v7x
topology: tpu7x:2x2x1
jax: 0.10.0
libtpu: 0.0.40
codegen_flags: <defaults>
</compile_context>

<pallas_src>
import math

import jax
import jax.numpy as jnp
import numpy as np
from jax.experimental import pallas as pl
from jax.experimental.pallas import tpu as pltpu


def swiglub_kernel(x_ref, beta_ref, w1_ref, w2_ref, b1_ref, b2_ref, o_ref):
    # Per-input-channel beta scale.  (PyTorch also mutates x in place; the
    # kernel only reproduces the returned value, not that side effect.)
    x = x_ref[...] * beta_ref[...]                                   # (Br, K)

    # Two MXU matmuls with f32 accumulation; bias added once per tile (epilogue).
    y1 = jnp.dot(x, w1_ref[...], preferred_element_type=jnp.float32) + b1_ref[...]
    y2 = jnp.dot(x, w2_ref[...], preferred_element_type=jnp.float32) + b2_ref[...]

    # SiLU gate: y1 * sigmoid(y1); exp runs on the EUP slot.
    gate = y1 * (1.0 / (1.0 + jnp.exp(-y1)))
    o_ref[...] = (gate * y2).astype(o_ref.dtype)


def _pick_block(total, preferred, align):
    """Largest multiple of `align` <= `preferred` that divides `total`, else full dim."""
    if total <= preferred:
        return total
    b = (preferred // align) * align
    while b >= align:
        if total % b == 0:
            return b
        b -= align
    return total


def swiglub(x, beta, weight, bias, *, dim_out,
            block_rows=256, block_cols=512, compute_dtype=None):
    """x: (..., dim_in); beta: (dim_in,); weight: (2*dim_out, dim_in) (nn.Linear layout);
    bias: (2*dim_out,) or None.  Returns (..., dim_out) in x.dtype."""
    *lead, dim_in = x.shape
    assert weight.shape == (2 * dim_out, dim_in)
    # The PyTorch slice only broadcasts when dim_out >= dim_in, in which case
    # every input channel is scaled by beta.
    assert dim_out >= dim_in, "SwiGLUB requires dim_out >= dim_in"

    cdt = jnp.dtype(compute_dtype) if compute_dtype is not None else jnp.dtype(x.dtype)
    out_dtype = x.dtype

    R = int(np.prod(lead)) if lead else 1
    x2 = x.reshape(R, dim_in).astype(cdt)
    beta2 = beta.reshape(1, dim_in).astype(cdt)

    # Split + transpose the fused fc1 weight once at trace time (layout plumbing,
    # keeps all in-kernel tiles (8,128)-aligned and the output lane-dense).
    w1 = jnp.transpose(weight[:dim_out, :]).astype(cdt)               # (dim_in, dim_out)
    w2 = jnp.transpose(weight[dim_out:, :]).astype(cdt)               # (dim_in, dim_out)
    if bias is None:
        bias = jnp.zeros((2 * dim_out,), jnp.float32)
    b1 = bias[:dim_out].reshape(1, dim_out).astype(jnp.float32)
    b2 = bias[dim_out:].reshape(1, dim_out).astype(jnp.float32)

    br = _pick_block(R, block_rows, 8)          # row tile (sublane-aligned)
    bn = _pick_block(dim_out, block_cols, 128)  # output-column tile (lane-aligned)
    grid = (dim_out // bn, R // br)             # cols outer, rows inner -> weights stay resident
    # TODO(synk): for very large dim_in (>~8k) add a contraction-axis grid dim +
    # f32 accumulator so weight tiles fit v7x's 64 MiB VMEM.

    # Per-step VMEM footprint (double-buffered) -> scoped VMEM limit with headroom.
    csz = cdt.itemsize
    step_bytes = (br * dim_in * csz                      # x tile
                  + 2 * dim_in * bn * csz                # W1 + W2 tiles
                  + 2 * bn * 4                           # biases (f32)
                  + dim_in * csz                         # beta
                  + br * bn * jnp.dtype(out_dtype).itemsize)   # out tile
    vmem_limit = int(min(max(2 * step_bytes + (4 << 20), 32 << 20), 48 << 20))

    out = pl.pallas_call(
        swiglub_kernel,
        out_shape=jax.ShapeDtypeStruct((R, dim_out), out_dtype),
        grid_spec=pltpu.PrefetchScalarGridSpec(
            num_scalar_prefetch=0,
            grid=grid,
            in_specs=[
                pl.BlockSpec((br, dim_in), lambda n, r: (r, 0)),      # x rows
                pl.BlockSpec((1, dim_in), lambda n, r: (0, 0)),       # beta
                pl.BlockSpec((dim_in, bn), lambda n, r: (0, n)),      # W1 cols
                pl.BlockSpec((dim_in, bn), lambda n, r: (0, n)),      # W2 cols
                pl.BlockSpec((1, bn), lambda n, r: (0, n)),           # b1
                pl.BlockSpec((1, bn), lambda n, r: (0, n)),           # b2
            ],
            out_specs=pl.BlockSpec((br, bn), lambda n, r: (r, n)),
        ),
        compiler_params=pltpu.CompilerParams(
            dimension_semantics=("parallel", "parallel"),
            vmem_limit_bytes=vmem_limit),
    )(x2, beta2, w1, w2, b1, b2)

    return out.reshape(*lead, dim_out)


def swiglub_ref(x, beta, weight, bias, *, dim_out):
    """Pure-JAX reference mirroring the PyTorch forward (dim_out >= dim_in)."""
    xs = x * beta                                   # x[..., :dim_out] is all of x
    y = xs @ weight.T + (0.0 if bias is None else bias)
    y1, y2 = y[..., :dim_out], y[..., dim_out:]
    return (y1 * jax.nn.sigmoid(y1)) * y2


if __name__ == "__main__":
    # Small shapes consistent with the module (dim_out >= dim_in, GLU-style FFN).
    B, S, dim_in, dim_out = 2, 64, 64, 128

    key = jax.random.PRNGKey(0)
    kx, kb, kw, kbb = jax.random.split(key, 4)

    x = jax.random.normal(kx, (B, S, dim_in), dtype=jnp.float32)
    beta = 1.0 + 0.1 * jax.random.normal(kb, (dim_in,), dtype=jnp.float32)
    weight = jax.random.normal(kw, (2 * dim_out, dim_in), dtype=jnp.float32) / math.sqrt(dim_in)
    bias = 0.02 * jax.random.normal(kbb, (2 * dim_out,), dtype=jnp.float32)

    ref = swiglub_ref(x, beta, weight, bias, dim_out=dim_out)

    # f32 path (exact check against the reference).
    out = jax.block_until_ready(swiglub(x, beta, weight, bias, dim_out=dim_out))
    np.testing.assert_allclose(np.asarray(out), np.asarray(ref), rtol=1e-4, atol=1e-4)

    # bf16-operand path (MXU-native operands, f32 accumulation) — looser tolerance.
    out_bf16 = jax.block_until_ready(
        swiglub(x, beta, weight, bias, dim_out=dim_out, compute_dtype=jnp.bfloat16))
    np.testing.assert_allclose(np.asarray(out_bf16), np.asarray(ref), rtol=5e-2, atol=5e-2)

    print("KERNEL_OK")
</pallas_src>

<mosaic_0001>
module attributes {stable_mosaic.version = 11 : i64} {
  func.func @swiglub_kernel(%arg0: i32, %arg1: i32, %arg2: memref<128x64xf32, #tpu.memory_space<vmem>>, %arg3: memref<1x64xf32, #tpu.memory_space<vmem>>, %arg4: memref<64x128xf32, #tpu.memory_space<vmem>>, %arg5: memref<64x128xf32, #tpu.memory_space<vmem>>, %arg6: memref<1x128xf32, #tpu.memory_space<vmem>>, %arg7: memref<1x128xf32, #tpu.memory_space<vmem>>, %arg8: memref<128x128xf32, #tpu.memory_space<vmem>>) attributes {dimension_semantics = [#tpu.dimension_semantics<parallel>, #tpu.dimension_semantics<parallel>], iteration_bounds = array<i64: 1, 1>, scalar_prefetch = 0 : i64, scratch_operands = 0 : i64, tpu.core_type = #tpu.core_type<tc>, window_params = [{transform_indices = @transform_0, window_bounds = array<i64: 128, 64>}, {pipeline_mode = #tpu.pipeline_mode<synchronous>, transform_indices = @transform_1, window_bounds = array<i64: 1, 64>}, {transform_indices = @transform_2, window_bounds = array<i64: 64, 128>}, {transform_indices = @transform_3, window_bounds = array<i64: 64, 128>}, {transform_indices = @transform_4, window_bounds = array<i64: 1, 128>}, {transform_indices = @transform_5, window_bounds = array<i64: 1, 128>}, {transform_indices = @transform_6, window_bounds = array<i64: 128, 128>}]} {
    %c0 = arith.constant 0 : index
    %c0_0 = arith.constant 0 : index
    %0 = vector.load %arg2[%c0, %c0_0] : memref<128x64xf32, #tpu.memory_space<vmem>>, vector<128x64xf32>
    %c0_1 = arith.constant 0 : index
    %c0_2 = arith.constant 0 : index
    %1 = vector.load %arg3[%c0_1, %c0_2] : memref<1x64xf32, #tpu.memory_space<vmem>>, vector<1x64xf32>
    %2 = vector.broadcast %1 : vector<1x64xf32> to vector<128x64xf32>
    %3 = arith.mulf %0, %2 : vector<128x64xf32>
    %c0_3 = arith.constant 0 : index
    %c0_4 = arith.constant 0 : index
    %4 = vector.load %arg4[%c0_3, %c0_4] : memref<64x128xf32, #tpu.memory_space<vmem>>, vector<64x128xf32>
    %cst = arith.constant dense<0.000000e+00> : vector<128x128xf32>
    %5 = tpu.matmul %3, %4, %cst {dimension_numbers = #tpu.dot_dimension_numbers<[1], [0], [0], [1], [0, 0, 1, 1], [], []>} : vector<128x64xf32>, vector<64x128xf32>, vector<128x128xf32> -> vector<128x128xf32>
    %c0_5 = arith.constant 0 : index
    %c0_6 = arith.constant 0 : index
    %6 = vector.load %arg6[%c0_5, %c0_6] : memref<1x128xf32, #tpu.memory_space<vmem>>, vector<1x128xf32>
    %7 = vector.broadcast %6 : vector<1x128xf32> to vector<128x128xf32>
    %8 = arith.addf %5, %7 : vector<128x128xf32>
    %c0_7 = arith.constant 0 : index
    %c0_8 = arith.constant 0 : index
    %9 = vector.load %arg5[%c0_7, %c0_8] : memref<64x128xf32, #tpu.memory_space<vmem>>, vector<64x128xf32>
    %cst_9 = arith.constant dense<0.000000e+00> : vector<128x128xf32>
    %10 = tpu.matmul %3, %9, %cst_9 {dimension_numbers = #tpu.dot_dimension_numbers<[1], [0], [0], [1], [0, 0, 1, 1], [], []>} : vector<128x64xf32>, vector<64x128xf32>, vector<128x128xf32> -> vector<128x128xf32>
    %c0_10 = arith.constant 0 : index
    %c0_11 = arith.constant 0 : index
    %11 = vector.load %arg7[%c0_10, %c0_11] : memref<1x128xf32, #tpu.memory_space<vmem>>, vector<1x128xf32>
    %12 = vector.broadcast %11 : vector<1x128xf32> to vector<128x128xf32>
    %13 = arith.addf %10, %12 : vector<128x128xf32>
    %cst_12 = arith.constant 0.000000e+00 : f32
    %14 = vector.broadcast %cst_12 : f32 to vector<128x128xf32>
    %15 = arith.subf %14, %8 : vector<128x128xf32>
    %16 = math.exp %15 : vector<128x128xf32>
    %cst_13 = arith.constant 1.000000e+00 : f32
    %17 = vector.broadcast %cst_13 : f32 to vector<128x128xf32>
    %18 = arith.addf %17, %16 : vector<128x128xf32>
    %cst_14 = arith.constant 1.000000e+00 : f32
    %19 = vector.broadcast %cst_14 : f32 to vector<128x128xf32>
    %20 = arith.divf %19, %18 : vector<128x128xf32>
    %21 = arith.mulf %8, %20 : vector<128x128xf32>
    %22 = arith.mulf %21, %13 : vector<128x128xf32>
    %c0_15 = arith.constant 0 : index
    %c0_16 = arith.constant 0 : index
    %23 = vector.load %arg8[%c0_15, %c0_16] : memref<128x128xf32, #tpu.memory_space<vmem>>, vector<128x128xf32>
    tpu.vector_store %arg8[%c0_15, %c0_16], %22 {strides = array<i32>} : memref<128x128xf32, #tpu.memory_space<vmem>>, vector<128x128xf32>,
    return
  }
  func.func @transform_0(%arg0: i32, %arg1: i32) -> (i32, i32) {
    %c0_i32 = arith.constant 0 : i32
    %c0_i32_0 = arith.constant 0 : i32
    return %arg1, %c0_i32 : i32, i32
  }
  func.func @transform_1(%arg0: i32, %arg1: i32) -> (i32, i32) {
    %c0_i32 = arith.constant 0 : i32
    %c0_i32_0 = arith.constant 0 : i32
    %c0_i32_1 = arith.constant 0 : i32
    return %c0_i32, %c0_i32_0 : i32, i32
  }
  func.func @transform_2(%arg0: i32, %arg1: i32) -> (i32, i32) {
    %c0_i32 = arith.constant 0 : i32
    %c0_i32_0 = arith.constant 0 : i32
    return %c0_i32, %arg0 : i32, i32
  }
  func.func @transform_3(%arg0: i32, %arg1: i32) -> (i32, i32) {
    %c0_i32 = arith.constant 0 : i32
    %c0_i32_0 = arith.constant 0 : i32
    return %c0_i32, %arg0 : i32, i32
  }
  func.func @transform_4(%arg0: i32, %arg1: i32) -> (i32, i32) {
    %c0_i32 = arith.constant 0 : i32
    %c0_i32_0 = arith.constant 0 : i32
    return %c0_i32, %arg0 : i32, i32
  }
  func.func @transform_5(%arg0: i32, %arg1: i32) -> (i32, i32) {
    %c0_i32 = arith.constant 0 : i32
    %c0_i32_0 = arith.constant 0 : i32
    return %c0_i32, %arg0 : i32, i32
  }
  func.func @transform_6(%arg0: i32, %arg1: i32) -> (i32, i32) {
    %c0_i32 = arith.constant 0 : i32
    return %arg1, %arg0 : i32, i32
  }
}

</mosaic_0001>

<bundles_post_ra>
// kernel: tpu_custom_call.1
= control target key start
LH: loop header
LB: loop body
LE: loop exit
PB: predicated region body
PF: predicated region fallthrough
CT: control target
= control target key end

     0   :  { %vm78_vm0 = vcmask 523264   ;;  %s1231_s0 = inlined_call_operand.vmem [shape: f32[128,64], index: 0, kind: input, shape index: {}]   ;;  %s1232_s1 = inlined_call_operand.vmem [shape: f32[1,64], index: 1, kind: input, shape index: {}]   ;;  %s1233_s2 = inlined_call_operand.vmem [shape: f32[64,128], index: 2, kind: input, shape index: {}]   ;;  %s1234_s3 = inlined_call_operand.vmem [shape: f32[64,128], index: 3, kind: input, shape index: {}]   ;;  %s1235_s4 = inlined_call_operand.vmem [shape: f32[1,128], index: 4, kind: input, shape index: {}]   ;;  %s1236_s5 = inlined_call_operand.vmem [shape: f32[1,128], index: 5, kind: input, shape index: {}]   ;;  %s1237_s6 = inlined_call_operand.hbm [shape: f32[128,128], index: 6, kind: output, shape index: {}]  }
   0x1   :  { %v63_v0 = vld [vmem:[%s1233_s2] sm:$0xff]  ;;  %v64_v1 = vld [vmem:[%s1233_s2 + $0x8] sm:$0xff]  ;;  %v65_v2 = vld [vmem:[%s1233_s2 + $0x10] sm:$0xff] }
   0x2   :  { %v755_v3 = vpack.c.bf16 %v64_v1, %v63_v0  ;;  %v66_v4 = vld [vmem:[%s1233_s2 + $0x18] sm:$0xff]  ;;  %v67_v6 = vld [vmem:[%s1233_s2 + $0x20] sm:$0xff]  ;;  %v68_v7 = vld [vmem:[%s1233_s2 + $0x28] sm:$0xff] }
   0x3   :  { %v759_v5 = vpack.c.bf16 %v66_v4, %v65_v2  ;;  %v24_v8 = vld [vmem:[%s1231_s0] sm:$0xff]  ;;  %v763_v11 = vpack.c.bf16 %v68_v7, %v67_v6  ;;  %v69_v13 = vld [vmem:[%s1233_s2 + $0x30] sm:$0xff]  ;;  %v70_v14 = vld [vmem:[%s1233_s2 + $0x38] sm:$0xff] }
   0x4   :  { %756 = vmatprep.subr.bf16.mxu0 %v755_v3  ;;  %v940_v9 = vld [vmem:[%s1232_s1] ss:$0 sm:$0xff]  ;;  %v273_v15 = vld [vmem:[%s1234_s3 + $0x8] sm:$0xff]  ;;  %v274_v17 = vld [vmem:[%s1234_s3 + $0x10] sm:$0xff]  ;;  %v767_v22 = vpack.c.bf16 %v70_v14, %v69_v13 }
   0x5   :  { %758 = vmatpush3.bf16.msra.mxu0 %v755_v3  ;;  %v47_v10 = vmul.f32 %v940_v9, %v24_v8  ;;  %v272_v12 = vld [vmem:[%s1234_s3] sm:$0xff]  ;;  %v275_v18 = vld [vmem:[%s1234_s3 + $0x18] sm:$0xff]  ;;  %v277_v21 = vld [vmem:[%s1234_s3 + $0x28] sm:$0xff] }
   0x6   :  { %760 = vmatprep.subr.bf16.mxu0 %v759_v5  ;;  %v771_v16 = vpack.c.bf16 %v273_v15, %v272_v12  ;;  %v775_v19 = vpack.c.bf16 %v275_v18, %v274_v17  ;;  %v276_v20 = vld [vmem:[%s1234_s3 + $0x20] sm:$0xff] }
   0x7   :  { %691 = vmatprep.mubr.msk.f32.mxu0 %vm78_vm0, %v47_v10  ;;  %731 = vmatprep.mubr.msk.f32.mxu1 %vm78_vm0, %v47_v10  ;;  %v779_v23 = vpack.c.bf16 %v277_v21, %v276_v20 }
   0x8   :  { %772 = vmatprep.subr.bf16.mxu1 %v771_v16 }
   0x9   :  { %762 = vmatpush3.bf16.msra.mxu0 %v759_v5  ;;  %774 = vmatpush3.bf16.msra.mxu1 %v771_v16 }
   0xa   :  { %764 = vmatprep.subr.bf16.mxu0 %v763_v11  ;;  %776 = vmatprep.subr.bf16.mxu1 %v775_v19 }
   0xb   :  { %11 = vsyncpa [#allocation3], 0  ;;  %v25_v24 = vld [vmem:[%s1231_s0 + $0x8] sm:$0xff]  ;;  %v278_v25 = vld [vmem:[%s1234_s3 + $0x30] sm:$0xff] }
   0xc   :  { %v279_v26 = vld [vmem:[%s1234_s3 + $0x38] sm:$0xff]  ;;  %v26_v27 = vld [vmem:[%s1231_s0 + $0x10] sm:$0xff]  ;;  %v48_v28 = vmul.f32 %v940_v9, %v25_v24  ;;  %v28_v32 = vld [vmem:[%s1231_s0 + $0x20] sm:$0xff] }
   0xd   :  { %766 = vmatpush3.bf16.msra.mxu0 %v763_v11  ;;  %778 = vmatpush3.bf16.msra.mxu1 %v775_v19  ;;  %v783_v29 = vpack.c.bf16 %v279_v26, %v278_v25  ;;  %v49_v30 = vmul.f32 %v940_v9, %v26_v27  ;;  %v27_v31 = vld [vmem:[%s1231_s0 + $0x18] sm:$0xff]  ;;  %v51_v34 = vmul.f32 %v940_v9, %v28_v32  ;;  %v29_v35 = vld [vmem:[%s1231_s0 + $0x28] sm:$0xff]  ;;  %v30_v36 = vld [vmem:[%s1231_s0 + $0x30] sm:$0xff] }
   0xe   :  { %768 = vmatprep.subr.bf16.mxu0 %v767_v22  ;;  %780 = vmatprep.subr.bf16.mxu1 %v779_v23  ;;  %v50_v33 = vmul.f32 %v940_v9, %v27_v31  ;;  %v52_v37 = vmul.f32 %v940_v9, %v29_v35  ;;  %v53_v38 = vmul.f32 %v940_v9, %v30_v36  ;;  %v31_v39 = vld [vmem:[%s1231_s0 + $0x38] sm:$0xff]  ;;  %v32_v40 = vld [vmem:[%s1231_s0 + $0x40] sm:$0xff]  ;;  %v33_v43 = vld [vmem:[%s1231_s0 + $0x48] sm:$0xff] }
   0xf   :  { %v54_v41 = vmul.f32 %v940_v9, %v31_v39  ;;  %v55_v42 = vmul.f32 %v940_v9, %v32_v40  ;;  %v34_v44 = vld [vmem:[%s1231_s0 + $0x50] sm:$0xff]  ;;  %v56_v45 = vmul.f32 %v940_v9, %v33_v43  ;;  %v35_v47 = vld [vmem:[%s1231_s0 + $0x58] sm:$0xff]  ;;  %v36_v48 = vld [vmem:[%s1231_s0 + $0x60] sm:$0xff] }
  0x10   :  { %v57_v46 = vmul.f32 %v940_v9, %v34_v44  ;;  %v58_v49 = vmul.f32 %v940_v9, %v35_v47  ;;  %v59_v50 = vmul.f32 %v940_v9, %v36_v48  ;;  %v37_v51 = vld [vmem:[%s1231_s0 + $0x68] sm:$0xff]  ;;  %v38_v52 = vld [vmem:[%s1231_s0 + $0x70] sm:$0xff]  ;;  %v39_v55 = vld [vmem:[%s1231_s0 + $0x78] sm:$0xff] }
  0x11   :  { %770 = vmatpush3.bf16.msra.mxu0 %v767_v22  ;;  %782 = vmatpush3.bf16.msra.mxu1 %v779_v23  ;;  %v60_v53 = vmul.f32 %v940_v9, %v37_v51  ;;  %v61_v54 = vmul.f32 %v940_v9, %v38_v52  ;;  %v62_v56 = vmul.f32 %v940_v9, %v39_v55  ;;  %v1068_v57 = vld [vmem:[%s1235_s4] ss:$0 sm:$0xff] }
  0x12   :  { %784 = vmatprep.subr.bf16.mxu1 %v783_v29 }
  0x14   :  { %692 = vmatmul.mubr.msk.f32.vlgmr.msra.gmra.mrb[0].mxu0 %vm78_vm0, %v48_v28 }
  0x15   :  { %694 = vmatprep.mubr.msk.f32.mxu0 %vm78_vm0, %v49_v30  ;;  %786 = vmatpush3.bf16.msra.mxu1 %v783_v29 }
  0x18   :  { %695 = vmatmul.mubr.msk.f32.gmra.mrb[2].mxu0 %vm78_vm0, %v50_v33  ;;  %732 = vmatmul.mubr.msk.f32.vlgmr.msra.gmra.mrb[0].mxu1 %vm78_vm0, %v48_v28 }
  0x19   :  { %697 = vmatprep.mubr.msk.f32.mxu0 %vm78_vm0, %v51_v34  ;;  %734 = vmatprep.mubr.msk.f32.mxu1 %vm78_vm0, %v49_v30 }
  0x1c   :  { %698 = vmatmul.mubr.msk.f32.gmra.mrb[4].mxu0 %vm78_vm0, %v52_v37  ;;  %735 = vmatmul.mubr.msk.f32.gmra.mrb[2].mxu1 %vm78_vm0, %v50_v33 }
  0x1d   :  { %700 = vmatprep.mubr.msk.f32.mxu0 %vm78_vm0, %v53_v38  ;;  %737 = vmatprep.mubr.msk.f32.mxu1 %vm78_vm0, %v51_v34 }
  0x20   :  { %701 = vmatmul.mubr.msk.f32.gmra.mrb[6].mxu0 %vm78_vm0, %v54_v41  ;;  %738 = vmatmul.mubr.msk.f32.gmra.mrb[4].mxu1 %vm78_vm0, %v52_v37 }
  0x21   :  { %703 = vmatprep.mubr.msk.f32.mxu0 %vm78_vm0, %v55_v42  ;;  %740 = vmatprep.mubr.msk.f32.mxu1 %vm78_vm0, %v53_v38 }
  0x24   :  { %704 = vmatmul.mubr.msk.f32.gmra.mrb[8].mxu0 %vm78_vm0, %v56_v45  ;;  %741 = vmatmul.mubr.msk.f32.gmra.mrb[6].mxu1 %vm78_vm0, %v54_v41 }
  0x25   :  { %706 = vmatprep.mubr.msk.f32.mxu0 %vm78_vm0, %v57_v46  ;;  %743 = vmatprep.mubr.msk.f32.mxu1 %vm78_vm0, %v55_v42 }
  0x28   :  { %707 = vmatmul.mubr.msk.f32.gmra.mrb[10].mxu0 %vm78_vm0, %v58_v49  ;;  %744 = vmatmul.mubr.msk.f32.gmra.mrb[8].mxu1 %vm78_vm0, %v56_v45 }
  0x29   :  { %709 = vmatprep.mubr.msk.f32.mxu0 %vm78_vm0, %v59_v50  ;;  %746 = vmatprep.mubr.msk.f32.mxu1 %vm78_vm0, %v57_v46 }
  0x2c   :  { %710 = vmatmul.mubr.msk.f32.gmra.mrb[12].mxu0 %vm78_vm0, %v60_v53  ;;  %747 = vmatmul.mubr.msk.f32.gmra.mrb[10].mxu1 %vm78_vm0, %v58_v49 }
  0x2d   :  { %712 = vmatprep.mubr.msk.f32.mxu0 %vm78_vm0, %v61_v54  ;;  %749 = vmatprep.mubr.msk.f32.mxu1 %vm78_vm0, %v59_v50 }
  0x30   :  { %713 = vmatmul.mubr.msk.f32.gmra.mrb[14].mxu0 %vm78_vm0, %v62_v56  ;;  %750 = vmatmul.mubr.msk.f32.gmra.mrb[12].mxu1 %vm78_vm0, %v60_v53 }
  0x31   :  { %752 = vmatprep.mubr.msk.f32.mxu1 %vm78_vm0, %v61_v54 }
  0x34   :  { %753 = vmatmul.mubr.msk.f32.gmra.mrb[14].mxu1 %vm78_vm0, %v62_v56 }
  0xe7   :  { %v693_v58 = vpop.f32.mrb[0].mxu0 }
  0xe8   :  { %v1071_v59 = vadd.f32 %v693_v58, %v1068_v57  ;;  %v193_v60 = vpop.f32.mrb[1].mxu0 }
  0xe9   :  { %v1074_v61 = vadd.f32 %v1068_v57, %v193_v60 }
  0xea   :  { %v433_v62 = vsub.f32 0.0, %v1071_v59 }
  0xeb   :  { %v432_v63 = vsub.f32 0.0, %v1074_v61  ;;  %v696_v0 = vpop.f32.mrb[2].mxu0  ;;  %v1084_v6 = vpop.f32.mrb[0].mxu1 }
  0xec   :  { %v450_v1 = vmul.f32 1.442695, %v433_v62  ;;  %v1079_v2 = vadd.f32 %v696_v0, %v1068_v57  ;;  %v203_v3 = vpop.f32.mrb[3].mxu0  ;;  %v1087_v8 = vpop.f32.mrb[1].mxu1 }
  0xed   :  { %v448_v4 = vmul.f32 1.442695, %v432_v63  ;;  %v1082_v5 = vadd.f32 %v1068_v57, %v203_v3  ;;  %v1144_v3 = vld [vmem:[%s1236_s5] ss:$0 sm:$0xff]  ;;  %s878_s5 = smov [#allocation2]  }
  0xee   :  { %790 = vpow2.f32 %v450_v1  ;;  %v435_v7 = vsub.f32 0.0, %v1079_v2  ;;  %s581_s12 = sshll.u32 %s878_s5, 4  ;;  %s582_s12 = int_to_ptr.vmem [resolvable:$true] %s581_s12 }
  0xef   :  { %792 = vpow2.f32 %v448_v4  ;;  %v434_v9 = vsub.f32 0.0, %v1082_v5  ;;  %v699_v10 = vpop.f32.mrb[4].mxu0  ;;  %v1096_v16 = vpop.f32.mrb[2].mxu1  ;;  %s854_s13 = scalar_lea.vmem %s582_s12, 2048  ;;  %p859_p1 = scmp.lt.s32.totalorder %s582_s12, %s582_s12 }
  0xf0   :  { %v454_v11 = vmul.f32 1.442695, %v435_v7  ;;  %v1091_v12 = vadd.f32 %v699_v10, %v1068_v57  ;;  %v213_v13 = vpop.f32.mrb[5].mxu0  ;;  %v1099_v18 = vpop.f32.mrb[3].mxu1  ;;  %p855_p0 = scmp.ne.s32.totalorder %s582_s12, %s854_s13  ;;  %p860_p2 = scmp.lt.s32.totalorder %s854_s13, %s854_s13 }
  0xf1   :  { %v452_v14 = vmul.f32 1.442695, %v434_v9  ;;  %v1094_v15 = vadd.f32 %v1068_v57, %v213_v13 }
  0xf2   :  { %794 = vpow2.f32 %v454_v11  ;;  %v437_v17 = vsub.f32 0.0, %v1091_v12  ;;  %p861_p3 = por %p860_p2, %p859_p1 }
  0xf3   :  { %796 = vpow2.f32 %v452_v14  ;;  %v436_v19 = vsub.f32 0.0, %v1094_v15  ;;  %v702_v20 = vpop.f32.mrb[6].mxu0  ;;  %v1108_v26 = vpop.f32.mrb[4].mxu1 }
  0xf4   :  { %v458_v21 = vmul.f32 1.442695, %v437_v17  ;;  %v1103_v22 = vadd.f32 %v702_v20, %v1068_v57  ;;  %v223_v23 = vpop.f32.mrb[7].mxu0  ;;  %v1111_v28 = vpop.f32.mrb[5].mxu1  ;;  %p862_p4 = pnand %p861_p3, %p855_p0 }
  0xf5   :  { %v456_v24 = vmul.f32 1.442695, %v436_v19  ;;  %v1106_v25 = vadd.f32 %v1068_v57, %v223_v23 }
  0xf6   :  { %798 = vpow2.f32 %v458_v21  ;;  %v439_v27 = vsub.f32 0.0, %v1103_v22  ;;  %v359_v21 = vadd.f32 %v1084_v6, %v1144_v3 }
  0xf7   :  { %800 = vpow2.f32 %v456_v24  ;;  %v438_v29 = vsub.f32 0.0, %v1106_v25  ;;  %v705_v30 = vpop.f32.mrb[8].mxu0  ;;  %v1120_v39 = vpop.f32.mrb[6].mxu1 }
  0xf8   :  { %v791_v31 = vpop.eup %790  ;;  %v462_v32 = vmul.f32 1.442695, %v439_v27  ;;  %v1115_v33 = vadd.f32 %v705_v30, %v1068_v57  ;;  %v233_v34 = vpop.f32.mrb[9].mxu0  ;;  %v354_v30 = vadd.f32 %v1144_v3, %v1087_v8 }
  0xf9   :  { %v793_v35 = vpop.eup %792  ;;  %v481_v36 = vadd.f32 1.0, %v791_v31  ;;  %v460_v37 = vmul.f32 1.442695, %v438_v29  ;;  %v1118_v38 = vadd.f32 %v1068_v57, %v233_v34  ;;  %v1123_v42 = vpop.f32.mrb[7].mxu1 }
  0xfa   :  { %v480_v40 = vadd.f32 1.0, %v793_v35  ;;  %802 = vpow2.f32 %v462_v32  ;;  %v441_v41 = vsub.f32 0.0, %v1115_v33 }
  0xfb   :  { %804 = vrcp.f32 %v481_v36  ;;  %v440_v43 = vsub.f32 0.0, %v1118_v38  ;;  %v708_v44 = vpop.f32.mrb[10].mxu0  ;;  %v1132_v53 = vpop.f32.mrb[8].mxu1 }
  0xfc   :  { %v795_v45 = vpop.eup %794  ;;  %806 = vrcp.f32 %v480_v40  ;;  %v466_v46 = vmul.f32 1.442695, %v441_v41  ;;  %v1127_v47 = vadd.f32 %v708_v44, %v1068_v57  ;;  %v243_v48 = vpop.f32.mrb[11].mxu0 }
  0xfd   :  { %v797_v49 = vpop.eup %796  ;;  %v483_v50 = vadd.f32 1.0, %v795_v45  ;;  %808 = vpow2.f32 %v460_v37  ;;  %v464_v51 = vmul.f32 1.442695, %v440_v43  ;;  %v1130_v52 = vadd.f32 %v1068_v57, %v243_v48  ;;  %v1135_v56 = vpop.f32.mrb[9].mxu1 }
  0xfe   :  { %v482_v54 = vadd.f32 1.0, %v797_v49  ;;  %810 = vpow2.f32 %v466_v46  ;;  %v443_v55 = vsub.f32 0.0, %v1127_v47 }
  0xff   :  { %812 = vrcp.f32 %v483_v50  ;;  %v442_v58 = vsub.f32 0.0, %v1130_v52  ;;  %v711_v60 = vpop.f32.mrb[12].mxu0  ;;  %v1149_v11 = vpop.f32.mrb[10].mxu1 }
 0x100   :  { %v799_v62 = vpop.eup %798  ;;  %814 = vrcp.f32 %v482_v54  ;;  %v470_v63 = vmul.f32 1.442695, %v443_v55  ;;  %v1139_v0 = vadd.f32 %v711_v60, %v1068_v57  ;;  %v253_v1 = vpop.f32.mrb[13].mxu0  ;;  %v364_v55 = vadd.f32 %v1144_v3, %v1099_v18 }
 0x101   :  { %v801_v4 = vpop.eup %800  ;;  %v485_v7 = vadd.f32 1.0, %v799_v62  ;;  %816 = vpow2.f32 %v464_v51  ;;  %v468_v9 = vmul.f32 1.442695, %v442_v58  ;;  %v1147_v10 = vadd.f32 %v1068_v57, %v253_v1  ;;  %v1152_v17 = vpop.f32.mrb[11].mxu1 }
 0x102   :  { %v484_v13 = vadd.f32 1.0, %v801_v4  ;;  %818 = vpow2.f32 %v470_v63  ;;  %v445_v14 = vsub.f32 0.0, %v1139_v0  ;;  %v379_v18 = vadd.f32 %v1108_v26, %v1144_v3 }
 0x103   :  { %820 = vrcp.f32 %v485_v7  ;;  %v444_v19 = vsub.f32 0.0, %v1147_v10  ;;  %v714_v20 = vpop.f32.mrb[14].mxu0  ;;  %v1165_v36 = vpop.f32.mrb[12].mxu1 }
 0x104   :  { %v803_v23 = vpop.eup %802  ;;  %822 = vrcp.f32 %v484_v13  ;;  %v474_v24 = vmul.f32 1.442695, %v445_v14  ;;  %v1158_v27 = vadd.f32 %v714_v20, %v1068_v57  ;;  %v263_v29 = vpop.f32.mrb[15].mxu0  ;;  %v374_v14 = vadd.f32 %v1144_v3, %v1111_v28 }
 0x105   :  { %v805_v31 = vpop.eup %804  ;;  %v487_v32 = vadd.f32 1.0, %v803_v23  ;;  %824 = vpow2.f32 %v468_v9  ;;  %v472_v34 = vmul.f32 1.442695, %v444_v19  ;;  %v1163_v35 = vadd.f32 %v1068_v57, %v263_v29  ;;  %v1169_v41 = vpop.f32.mrb[13].mxu1 }
 0x106   :  { %v807_v6 = vpop.eup %806  ;;  %v529_v37 = vmul.f32 %v805_v31, %v1071_v59  ;;  %826 = vpow2.f32 %v474_v24  ;;  %v447_v40 = vsub.f32 0.0, %v1158_v27  ;;  %v369_v57 = vadd.f32 %v1096_v16, %v1144_v3 }
 0x107   :  { %v809_v43 = vpop.eup %808  ;;  %v528_v8 = vmul.f32 %v807_v6, %v1074_v61  ;;  %828 = vrcp.f32 %v487_v32  ;;  %v446_v44 = vsub.f32 0.0, %v1163_v35  ;;  %v1177_v58 = vpop.f32.mrb[14].mxu1  ;;  %v389_v29 = vadd.f32 %v1120_v39, %v1144_v3 }
 0x108   :  { %v811_v45 = vpop.eup %810  ;;  %v486_v46 = vadd.f32 1.0, %v809_v43  ;;  %830 = vpow2.f32 %v472_v34  ;;  %v478_v48 = vmul.f32 1.442695, %v447_v40  ;;  %v545_v49 = vmul.f32 %v529_v37, %v359_v21  ;;  %v1180_v16 = vpop.f32.mrb[15].mxu1 }
 0x109   :  { %v813_v59 = vpop.eup %812  ;;  %v489_v50 = vadd.f32 1.0, %v811_v45  ;;  %v476_v51 = vmul.f32 1.442695, %v446_v44  ;;  %v544_v54 = vmul.f32 %v528_v8, %v354_v30  ;;  %v399_v40 = vadd.f32 %v1132_v53, %v1144_v3 }
 0x10a   :  { %v815_v61 = vpop.eup %814  ;;  %v531_v60 = vmul.f32 %v813_v59, %v1079_v2  ;;  %832 = vrcp.f32 %v486_v46  ;;  %561 = vst [vmem:[#allocation2 + $0x8] sm:$0xff] %v545_v49  ;;  %v394_v46 = vadd.f32 %v1144_v3, %v1135_v56  ;;  %v409_v53 = vadd.f32 %v1149_v11, %v1144_v3 }
 0x10b   :  { %v817_v62 = vpop.eup %816  ;;  %v530_v63 = vmul.f32 %v815_v61, %v1082_v5  ;;  %834 = vrcp.f32 %v489_v50  ;;  %560 = vst [vmem:[#allocation2] sm:$0xff] %v544_v54 }
 0x10c   :  { %v819_v1 = vpop.eup %818  ;;  %v488_v4 = vadd.f32 1.0, %v817_v62  ;;  %836 = vpow2.f32 %v478_v48  ;;  %v547_v7 = vmul.f32 %v531_v60, %v369_v57 }
 0x10d   :  { %v821_v9 = vpop.eup %820  ;;  %v491_v13 = vadd.f32 1.0, %v819_v1  ;;  %838 = vpow2.f32 %v476_v51  ;;  %v546_v2 = vmul.f32 %v530_v63, %v364_v55  ;;  %v404_v51 = vadd.f32 %v1144_v3, %v1152_v17 }
 0x10e   :  { %v823_v19 = vpop.eup %822  ;;  %v533_v20 = vmul.f32 %v821_v9, %v1091_v12  ;;  %840 = vrcp.f32 %v488_v4  ;;  %563 = vst [vmem:[#allocation2 + $0x18] sm:$0xff] %v547_v7  ;;  %v419_v55 = vadd.f32 %v1165_v36, %v1144_v3  ;;  %v429_v36 = vadd.f32 %v1177_v58, %v1144_v3 }
 0x10f   :  { %v825_v5 = vpop.eup %824  ;;  %v532_v21 = vmul.f32 %v823_v19, %v1094_v15  ;;  %842 = vrcp.f32 %v491_v13  ;;  %562 = vst [vmem:[#allocation2 + $0x10] sm:$0xff] %v546_v2  ;;  %v384_v15 = vadd.f32 %v1144_v3, %v1123_v42 }
 0x110   :  { %v827_v23 = vpop.eup %826  ;;  %v490_v24 = vadd.f32 1.0, %v825_v5  ;;  %v549_v26 = vmul.f32 %v533_v20, %v379_v18 }
 0x111   :  { %v829_v30 = vpop.eup %828  ;;  %v493_v31 = vadd.f32 1.0, %v827_v23  ;;  %v548_v32 = vmul.f32 %v532_v21, %v374_v14 }
 0x112   :  { %v831_v28 = vpop.eup %830  ;;  %v535_v34 = vmul.f32 %v829_v30, %v1103_v22  ;;  %844 = vrcp.f32 %v490_v24  ;;  %565 = vst [vmem:[#allocation2 + $0x28] sm:$0xff] %v549_v26 }
 0x113   :  { %846 = vrcp.f32 %v493_v31  ;;  %v492_v12 = vadd.f32 1.0, %v831_v28  ;;  %564 = vst [vmem:[#allocation2 + $0x20] sm:$0xff] %v548_v32 }
 0x114   :  { %v833_v6 = vpop.eup %832  ;;  %v551_v37 = vmul.f32 %v535_v34, %v389_v29 }
 0x115   :  { %v835_v39 = vpop.eup %834  ;;  %v534_v43 = vmul.f32 %v833_v6, %v1106_v25  ;;  %848 = vrcp.f32 %v492_v12 }
 0x116   :  { %v837_v8 = vpop.eup %836  ;;  %v537_v22 = vmul.f32 %v835_v39, %v1115_v33  ;;  %567 = vst [vmem:[#allocation2 + $0x38] sm:$0xff] %v551_v37 }
 0x117   :  { %v839_v44 = vpop.eup %838  ;;  %v495_v57 = vadd.f32 1.0, %v837_v8  ;;  %v550_v45 = vmul.f32 %v534_v43, %v384_v15 }
 0x118   :  { %v841_v42 = vpop.eup %840  ;;  %v494_v48 = vadd.f32 1.0, %v839_v44  ;;  %v553_v49 = vmul.f32 %v537_v22, %v399_v40 }
 0x119   :  { %v843_v59 = vpop.eup %842  ;;  %v536_v25 = vmul.f32 %v841_v42, %v1118_v38  ;;  %850 = vrcp.f32 %v495_v57  ;;  %566 = vst [vmem:[#allocation2 + $0x30] sm:$0xff] %v550_v45 }
 0x11a   :  { %v539_v33 = vmul.f32 %v843_v59, %v1127_v47  ;;  %852 = vrcp.f32 %v494_v48  ;;  %569 = vst [vmem:[#allocation2 + $0x48] sm:$0xff] %v553_v49  ;;  %v414_v47 = vadd.f32 %v1144_v3, %v1169_v41 }
 0x11b   :  { %v552_v50 = vmul.f32 %v536_v25, %v394_v46 }
 0x11c   :  { %v845_v56 = vpop.eup %844  ;;  %v555_v54 = vmul.f32 %v539_v33, %v409_v53 }
 0x11d   :  { %v847_v61 = vpop.eup %846  ;;  %v538_v11 = vmul.f32 %v845_v56, %v1130_v52  ;;  %568 = vst [vmem:[#allocation2 + $0x40] sm:$0xff] %v552_v50  ;;  %v424_v52 = vadd.f32 %v1144_v3, %v1180_v16 }
 0x11e   :  { %v541_v38 = vmul.f32 %v847_v61, %v1139_v0  ;;  %571 = vst [vmem:[#allocation2 + $0x58] sm:$0xff] %v555_v54 }
 0x11f   :  { %v849_v60 = vpop.eup %848  ;;  %v554_v62 = vmul.f32 %v538_v11, %v404_v51 }
 0x120   :  { %v540_v63 = vmul.f32 %v849_v60, %v1147_v10  ;;  %v557_v17 = vmul.f32 %v541_v38, %v419_v55 }
 0x121   :  { %570 = vst [vmem:[#allocation2 + $0x50] sm:$0xff] %v554_v62 }
 0x122   :  { %573 = vst [vmem:[#allocation2 + $0x68] sm:$0xff] %v557_v17  ;;  %v556_v1 = vmul.f32 %v540_v63, %v414_v47 }
 0x123   :  { %v851_v4 = vpop.eup %850 }
 0x124   :  { %v853_v0 = vpop.eup %852  ;;  %v543_v41 = vmul.f32 %v851_v4, %v1158_v27  ;;  %572 = vst [vmem:[#allocation2 + $0x60] sm:$0xff] %v556_v1 }
 0x125   :  { %v542_v7 = vmul.f32 %v853_v0, %v1163_v35 }
 0x126   :  { %v559_v10 = vmul.f32 %v543_v41, %v429_v36 }
 0x127   :  { %v558_v18 = vmul.f32 %v542_v7, %v424_v52 }
 0x128   :  { %575 = vst [vmem:[#allocation2 + $0x78] sm:$0xff] %v559_v10 }
 0x129   :  { %574 = vst [vmem:[#allocation2 + $0x70] sm:$0xff] %v558_v18 }
 0x12a   :  { %865 = shalt.err (!%p862_p4)
}
 0x12b   :  { %s866_s15 = scalar_lea.hbm %s1237_s6, 2048 }
 0x12c   :  { %p867_p5 = scmp.ne.s32.totalorder %s1237_s6, %s866_s15  ;;  %p870_p6 = scmp.lt.u32.totalorder %s866_s15, %s1237_s6 }
 0x12e   :  { %p872_p7 = pnand %p870_p6, %p867_p5 }
 0x130   :  { %875 = shalt.err (!%p872_p7)
}
 0x131   :  { %s879_s19 = smov 128   ;;  %s880_s20 = smov 8  }
 0x132   :  { %587 = dma.vmem_to_hbm [thread:$0]  %s582_s12, 2048, %s1237_s6, [#allocation3], %s879_s19, %s879_s19, %s880_s20  }
 0x133   :  { %876 = dma.done.wait [#allocation3], 2048  }
 0x134   :  { %877 = vsyncadd [#allocation3], 4294965248 }
 0x135   :  { %591 = vsyncpa [#allocation3], 1 }

</bundles_post_ra>
